<compile_context>
chip_gen: v7x
topology: tpu7x:2x2x1
jax: 0.10.0
libtpu: 0.0.40
codegen_flags: <defaults>
</compile_context>

<pallas_src>
import jax
import jax.numpy as jnp
from jax.experimental import pallas as pl
from jax.experimental.pallas import tpu as pltpu


# ----------------------------------------------------------------------------
# Fused kernel body.
#   refs = (x, [w0,b0, w1,b1, ...], wbig, mask, sel, bfc, out)
#   x    : (Bt*P, S*Cin)  rows = (batch row, final output pixel), batch-major
#   out  : (Bt, ncls)
# ----------------------------------------------------------------------------
def _make_fused_kernel(n_conv, n_pix):
    def kernel(*refs):
        x_ref = refs[0]
        conv_refs = refs[1:1 + 2 * n_conv]
        wbig_ref, msk_ref, sel_ref, bfc_ref, o_ref = refs[1 + 2 * n_conv:]

        rows = x_ref.shape[0]
        bt = rows // n_pix
        ncls = o_ref.shape[-1]

        # ---- conv chain: block-diagonal matmuls + folded-BN bias + ReLU ----
        # NOTE(perf): on v6e/v7x at real shapes, cast y / w to bf16 here
        # (keep preferred_element_type=f32).  Kept f32 for the 1e-4 check.
        y = x_ref[...]                                   # (Bt*P, S*Cin) f32
        for li in range(n_conv):                         # unrolled conv chain
            w = conv_refs[2 * li][...]
            b = conv_refs[2 * li + 1][...]
            y = jnp.dot(y, w, preferred_element_type=jnp.float32)
            y = jnp.maximum(y + b, 0.0)                  # folded-BN bias + ReLU

        # ---- encoder FC: out[b,n] = sum_{p,c} y[(b,p),c] * Wfc[p,c,n] ------
        # One big MXU pass over all pixel weights, then a 0/1 mask keeps each
        # row's own pixel block, a sublane reduce sums over pixels and a tiny
        # selection matmul folds the ncls-wide blocks.  Reshapes below only
        # regroup multiple-of-8 sublane blocks (layout-cheap).
        z = jnp.dot(y, wbig_ref[...],
                    preferred_element_type=jnp.float32)  # (Bt*P, P*ncls)
        z = (z.reshape(bt, n_pix, n_pix * ncls) * msk_ref[...]).sum(axis=1)
        out = jnp.dot(z, sel_ref[...],
                      preferred_element_type=jnp.float32) + bfc_ref[...]
        o_ref[...] = out.astype(o_ref.dtype)             # (Bt, ncls)

    return kernel


# ----------------------------------------------------------------------------
# Wrapper-side input permutation: NCHW -> (B, P, S*C)
#   rows  = final output pixels (row-major, matching PyTorch's H,W order)
#   cols  = hierarchical (coarse-to-fine 2x2 conv taps) x input channel
# Makes every stride-2 conv a contiguous block-diagonal matmul in-kernel.
# ----------------------------------------------------------------------------
def _space_to_patch(x_nchw, n_down):
    B, C, H, W = x_nchw.shape
    out_h, out_w = H >> n_down, W >> n_down
    x = x_nchw.reshape((B, C, out_h) + (2,) * n_down + (out_w,) + (2,) * n_down)
    perm = [0, 2, 3 + n_down]
    for j in range(n_down):
        perm += [3 + j, 4 + n_down + j]                  # (kh, kw) coarse->fine
    perm += [1]                                          # channels last
    x = x.transpose(perm)
    return x.reshape(B, out_h * out_w, (4 ** n_down) * C)


def cnn_multirnn_forward(x_nchw, kp, *, batch_tile=128):
    """x_nchw: (B, C, H, W); kp: prepared kernel params (see below)."""
    P = kp["n_pix"]
    ncls = kp["fc_b"].shape[-1]
    n_conv = len(kp["conv_w"])

    x_p = _space_to_patch(x_nchw.astype(jnp.float32), kp["n_down"])
    B, _, SC = x_p.shape

    # Batch tiling: Bt rows per grid step (Bt = B for small B, else 128).
    bt = B if B <= batch_tile else batch_tile
    n_blk = -(-B // bt)
    b_pad = n_blk * bt
    if b_pad != B:
        x_p = jnp.pad(x_p, ((0, b_pad - B), (0, 0), (0, 0)))
    x2d = x_p.reshape(b_pad * P, SC)                     # flat (rows, taps*cin)

    in_specs = [pl.BlockSpec((bt * P, SC), lambda i: (i, 0))]
    args = [x2d]
    for w, bias in zip(kp["conv_w"], kp["conv_b"]):
        in_specs.append(pl.BlockSpec(w.shape, lambda i: (0, 0)))
        in_specs.append(pl.BlockSpec(bias.shape, lambda i: (0, 0)))
        args += [w, bias]
    for name in ("fc_wbig", "fc_mask", "fc_sel", "fc_b"):
        in_specs.append(pl.BlockSpec(kp[name].shape, lambda i: (0, 0)))
        args.append(kp[name])

    out2d = pl.pallas_call(
        _make_fused_kernel(n_conv, P),
        out_shape=jax.ShapeDtypeStruct((b_pad, ncls), jnp.float32),
        grid=(n_blk,),
        in_specs=in_specs,
        out_specs=pl.BlockSpec((bt, ncls), lambda i: (i, 0)),
        compiler_params=pltpu.CompilerParams(
            dimension_semantics=("parallel",)),          # megacore / 2-TC
    )(*args)
    return out2d[:B].reshape(B, 1, ncls)    # == encoded.view(-1, 1, num_classes)


# ----------------------------------------------------------------------------
# Fold PyTorch-style params into kernel-ready form (host side, one-time).
# ----------------------------------------------------------------------------
def prepare_kernel_params(params, *, image_size, cnn_blocks):
    n_down = cnn_blocks - 1
    out_spatial = image_size // (2 ** n_down)
    P = out_spatial * out_spatial

    conv_w, conv_b = [], []
    for i, blk in enumerate(params["cnn_blocks"]):
        w = blk["w_mat"] * blk["bn_scale"][None, :]      # fold BN scale
        b = blk["bn_bias"]
        copies = 4 ** (n_down - i)                       # block-diag replication
        # NOTE(scale-up/v7x): kron grows as copies^2; for large cnn_blocks keep
        # the dense (k*k*cin, cout) weight and fold `copies` into M rows.
        conv_w.append(jnp.kron(jnp.eye(copies, dtype=w.dtype), w))
        conv_b.append(jnp.tile(b, copies)[None, :])

    c_last = params["cnn_blocks"][-1]["w_mat"].shape[1]
    ncls = params["fc_b"].shape[0]
    # fc_w is (fc_in, ncls) with PyTorch (C,H,W)-flatten rows (idx = c*P + p).
    # Wbig[c, p*ncls + n] = fc_w[c*P + p, n]  (single (C, P*ncls) FC weight).
    fc_wbig = params["fc_w"].reshape(c_last, P * ncls)
    fc_mask = jnp.repeat(jnp.eye(P, dtype=jnp.float32), ncls, axis=1)  # (P,P*ncls)
    fc_sel = jnp.tile(jnp.eye(ncls, dtype=jnp.float32), (P, 1))        # (P*ncls,ncls)
    return dict(n_down=n_down, n_pix=P,
                conv_w=conv_w, conv_b=conv_b,
                fc_wbig=fc_wbig, fc_mask=fc_mask, fc_sel=fc_sel,
                fc_b=params["fc_b"][None, :])


# ----------------------------------------------------------------------------
# Pure-JAX reference (lax.conv in NCHW, exactly mirroring PyTorch).
# ----------------------------------------------------------------------------
def reference_forward(x_nchw, params):
    x = x_nchw.astype(jnp.float32)
    for i, blk in enumerate(params["cnn_blocks"]):
        stride = 1 if i == 0 else 2
        x = jax.lax.conv_general_dilated(
            x, blk["w_conv"], window_strides=(stride, stride), padding="VALID",
            dimension_numbers=("NCHW", "OIHW", "NCHW"),
            precision=jax.lax.Precision.HIGHEST)
        s = blk["bn_scale"].reshape(1, -1, 1, 1)
        b = blk["bn_bias"].reshape(1, -1, 1, 1)
        x = jnp.maximum(x * s + b, 0.0)
    flat = x.reshape(x.shape[0], -1)
    out = jnp.dot(flat, params["fc_w"],
                  precision=jax.lax.Precision.HIGHEST) + params["fc_b"]
    return out.reshape(-1, 1, out.shape[-1])


# ----------------------------------------------------------------------------
# Deterministic parameter initialization (eval-mode BatchNorm).
# ----------------------------------------------------------------------------
def init_params(key, *, num_classes, input_channels, image_size,
                cnn_output_channels, cnn_blocks):
    channel_sizes = [(input_channels, cnn_output_channels // 2 ** (cnn_blocks - 1))]
    for _ in range(1, cnn_blocks):
        prev = channel_sizes[-1][-1]
        channel_sizes.append((prev, prev * 2))

    eps = 1e-5
    params = {"cnn_blocks": []}
    for i, (cin, cout) in enumerate(channel_sizes):
        k = 1 if i == 0 else 2
        key, k1, k2, k3, k4, k5 = jax.random.split(key, 6)
        w_conv = jax.random.normal(k1, (cout, cin, k, k), jnp.float32) * 0.2
        gamma = 1.0 + 0.1 * jax.random.normal(k2, (cout,), jnp.float32)
        beta = 0.1 * jax.random.normal(k3, (cout,), jnp.float32)
        rmean = 0.1 * jax.random.normal(k4, (cout,), jnp.float32)
        rvar = 1.0 + 0.1 * jnp.abs(jax.random.normal(k5, (cout,), jnp.float32))
        bn_scale = gamma / jnp.sqrt(rvar + eps)
        bn_bias = beta - rmean * bn_scale
        # conv-as-matmul weight: patch order (kh, kw, cin) -> (k*k*cin, cout)
        w_mat = jnp.transpose(w_conv, (2, 3, 1, 0)).reshape(k * k * cin, cout)
        params["cnn_blocks"].append(
            dict(w_conv=w_conv, w_mat=w_mat, bn_scale=bn_scale, bn_bias=bn_bias))

    out_spatial = image_size // 2 ** (cnn_blocks - 1)
    fc_in = out_spatial * out_spatial * channel_sizes[-1][1]
    key, k1, k2 = jax.random.split(key, 3)
    fc_w_pt = jax.random.normal(k1, (num_classes, fc_in), jnp.float32) * 0.05
    fc_b = jax.random.normal(k2, (num_classes,), jnp.float32) * 0.05
    params["fc_w"] = fc_w_pt.T                           # (fc_in, num_classes)
    params["fc_b"] = fc_b
    return params


# ----------------------------------------------------------------------------
if __name__ == "__main__":
    batch = 2
    num_classes = 8
    input_channels = 4
    image_size = 16
    cnn_output_channels = 32
    cnn_blocks = 3   # spatial: 16 -> 16 -> 8 -> 4 ; channels: 4 -> 8 -> 16 -> 32

    key = jax.random.PRNGKey(0)
    key, pkey, xkey = jax.random.split(key, 3)
    params = init_params(
        pkey,
        num_classes=num_classes,
        input_channels=input_channels,
        image_size=image_size,
        cnn_output_channels=cnn_output_channels,
        cnn_blocks=cnn_blocks,
    )
    kparams = prepare_kernel_params(
        params, image_size=image_size, cnn_blocks=cnn_blocks)

    x = jax.random.normal(xkey, (batch, input_channels, image_size, image_size),
                          jnp.float32)                    # NCHW, like PyTorch

    out = jax.block_until_ready(cnn_multirnn_forward(x, kparams))
    ref = jax.block_until_ready(reference_forward(x, params))

    assert out.shape == (batch, 1, num_classes), out.shape
    assert jnp.allclose(out, ref, atol=1e-4, rtol=1e-4), (
        float(jnp.max(jnp.abs(out - ref))))

    print("KERNEL_OK")
</pallas_src>

<mosaic_0001>
module attributes {stable_mosaic.version = 11 : i64} {
  func.func @kernel(%arg0: i32, %arg1: memref<32x64xf32, #tpu.memory_space<vmem>>, %arg2: memref<64x128xf32, #tpu.memory_space<vmem>>, %arg3: memref<1x128xf32, #tpu.memory_space<vmem>>, %arg4: memref<128x64xf32, #tpu.memory_space<vmem>>, %arg5: memref<1x64xf32, #tpu.memory_space<vmem>>, %arg6: memref<64x32xf32, #tpu.memory_space<vmem>>, %arg7: memref<1x32xf32, #tpu.memory_space<vmem>>, %arg8: memref<32x128xf32, #tpu.memory_space<vmem>>, %arg9: memref<16x128xf32, #tpu.memory_space<vmem>>, %arg10: memref<128x8xf32, #tpu.memory_space<vmem>>, %arg11: memref<1x8xf32, #tpu.memory_space<vmem>>, %arg12: memref<2x8xf32, #tpu.memory_space<vmem>>) attributes {dimension_semantics = [#tpu.dimension_semantics<parallel>], iteration_bounds = array<i64: 1>, scalar_prefetch = 0 : i64, scratch_operands = 0 : i64, tpu.core_type = #tpu.core_type<tc>, window_params = [{transform_indices = @transform_0, window_bounds = array<i64: 32, 64>}, {pipeline_mode = #tpu.pipeline_mode<synchronous>, transform_indices = @transform_1, window_bounds = array<i64: 64, 128>}, {pipeline_mode = #tpu.pipeline_mode<synchronous>, transform_indices = @transform_2, window_bounds = array<i64: 1, 128>}, {pipeline_mode = #tpu.pipeline_mode<synchronous>, transform_indices = @transform_3, window_bounds = array<i64: 128, 64>}, {pipeline_mode = #tpu.pipeline_mode<synchronous>, transform_indices = @transform_4, window_bounds = array<i64: 1, 64>}, {pipeline_mode = #tpu.pipeline_mode<synchronous>, transform_indices = @transform_5, window_bounds = array<i64: 64, 32>}, {pipeline_mode = #tpu.pipeline_mode<synchronous>, transform_indices = @transform_6, window_bounds = array<i64: 1, 32>}, {pipeline_mode = #tpu.pipeline_mode<synchronous>, transform_indices = @transform_7, window_bounds = array<i64: 32, 128>}, {pipeline_mode = #tpu.pipeline_mode<synchronous>, transform_indices = @transform_8, window_bounds = array<i64: 16, 128>}, {pipeline_mode = #tpu.pipeline_mode<synchronous>, transform_indices = @transform_9, window_bounds = array<i64: 128, 8>}, {pipeline_mode = #tpu.pipeline_mode<synchronous>, transform_indices = @transform_10, window_bounds = array<i64: 1, 8>}, {transform_indices = @transform_11, window_bounds = array<i64: 2, 8>}]} {
    %c0 = arith.constant 0 : index
    %c0_0 = arith.constant 0 : index
    %0 = vector.load %arg1[%c0, %c0_0] : memref<32x64xf32, #tpu.memory_space<vmem>>, vector<32x64xf32>
    %c0_1 = arith.constant 0 : index
    %c0_2 = arith.constant 0 : index
    %1 = vector.load %arg2[%c0_1, %c0_2] : memref<64x128xf32, #tpu.memory_space<vmem>>, vector<64x128xf32>
    %c0_3 = arith.constant 0 : index
    %c0_4 = arith.constant 0 : index
    %2 = vector.load %arg3[%c0_3, %c0_4] : memref<1x128xf32, #tpu.memory_space<vmem>>, vector<1x128xf32>
    %cst = arith.constant dense<0.000000e+00> : vector<32x128xf32>
    %3 = tpu.matmul %0, %1, %cst {dimension_numbers = #tpu.dot_dimension_numbers<[1], [0], [0], [1], [0, 0, 1, 1], [], []>} : vector<32x64xf32>, vector<64x128xf32>, vector<32x128xf32> -> vector<32x128xf32>
    %4 = vector.broadcast %2 : vector<1x128xf32> to vector<32x128xf32>
    %5 = arith.addf %3, %4 : vector<32x128xf32>
    %cst_5 = arith.constant 0.000000e+00 : f32
    %6 = vector.broadcast %cst_5 : f32 to vector<32x128xf32>
    %7 = arith.maximumf %5, %6 : vector<32x128xf32>
    %c0_6 = arith.constant 0 : index
    %c0_7 = arith.constant 0 : index
    %8 = vector.load %arg4[%c0_6, %c0_7] : memref<128x64xf32, #tpu.memory_space<vmem>>, vector<128x64xf32>
    %c0_8 = arith.constant 0 : index
    %c0_9 = arith.constant 0 : index
    %9 = vector.load %arg5[%c0_8, %c0_9] : memref<1x64xf32, #tpu.memory_space<vmem>>, vector<1x64xf32>
    %cst_10 = arith.constant dense<0.000000e+00> : vector<32x64xf32>
    %10 = tpu.matmul %7, %8, %cst_10 {dimension_numbers = #tpu.dot_dimension_numbers<[1], [0], [0], [1], [0, 0, 1, 1], [], []>} : vector<32x128xf32>, vector<128x64xf32>, vector<32x64xf32> -> vector<32x64xf32>
    %11 = vector.broadcast %9 : vector<1x64xf32> to vector<32x64xf32>
    %12 = arith.addf %10, %11 : vector<32x64xf32>
    %cst_11 = arith.constant 0.000000e+00 : f32
    %13 = vector.broadcast %cst_11 : f32 to vector<32x64xf32>
    %14 = arith.maximumf %12, %13 : vector<32x64xf32>
    %c0_12 = arith.constant 0 : index
    %c0_13 = arith.constant 0 : index
    %15 = vector.load %arg6[%c0_12, %c0_13] : memref<64x32xf32, #tpu.memory_space<vmem>>, vector<64x32xf32>
    %c0_14 = arith.constant 0 : index
    %c0_15 = arith.constant 0 : index
    %16 = vector.load %arg7[%c0_14, %c0_15] : memref<1x32xf32, #tpu.memory_space<vmem>>, vector<1x32xf32>
    %cst_16 = arith.constant dense<0.000000e+00> : vector<32x32xf32>
    %17 = tpu.matmul %14, %15, %cst_16 {dimension_numbers = #tpu.dot_dimension_numbers<[1], [0], [0], [1], [0, 0, 1, 1], [], []>} : vector<32x64xf32>, vector<64x32xf32>, vector<32x32xf32> -> vector<32x32xf32>
    %18 = vector.broadcast %16 : vector<1x32xf32> to vector<32x32xf32>
    %19 = arith.addf %17, %18 : vector<32x32xf32>
    %cst_17 = arith.constant 0.000000e+00 : f32
    %20 = vector.broadcast %cst_17 : f32 to vector<32x32xf32>
    %21 = arith.maximumf %19, %20 : vector<32x32xf32>
    %c0_18 = arith.constant 0 : index
    %c0_19 = arith.constant 0 : index
    %22 = vector.load %arg8[%c0_18, %c0_19] : memref<32x128xf32, #tpu.memory_space<vmem>>, vector<32x128xf32>
    %cst_20 = arith.constant dense<0.000000e+00> : vector<32x128xf32>
    %23 = tpu.matmul %21, %22, %cst_20 {dimension_numbers = #tpu.dot_dimension_numbers<[1], [0], [0], [1], [0, 0, 1, 1], [], []>} : vector<32x32xf32>, vector<32x128xf32>, vector<32x128xf32> -> vector<32x128xf32>
    %24 = vector.shape_cast %23 : vector<32x128xf32> to vector<2x16x128xf32>
    %c0_21 = arith.constant 0 : index
    %c0_22 = arith.constant 0 : index
    %25 = vector.load %arg9[%c0_21, %c0_22] : memref<16x128xf32, #tpu.memory_space<vmem>>, vector<16x128xf32>
    %26 = vector.shape_cast %25 : vector<16x128xf32> to vector<1x16x128xf32>
    %27 = vector.broadcast %26 : vector<1x16x128xf32> to vector<2x16x128xf32>
    %28 = arith.mulf %24, %27 : vector<2x16x128xf32>
    %cst_23 = arith.constant dense<0.000000e+00> : vector<2x128xf32>
    %29 = vector.multi_reduction <add>, %28, %cst_23 [1] : vector<2x16x128xf32> to vector<2x128xf32>
    %c0_24 = arith.constant 0 : index
    %c0_25 = arith.constant 0 : index
    %30 = vector.load %arg10[%c0_24, %c0_25] : memref<128x8xf32, #tpu.memory_space<vmem>>, vector<128x8xf32>
    %cst_26 = arith.constant dense<0.000000e+00> : vector<2x8xf32>
    %31 = tpu.matmul %29, %30, %cst_26 {dimension_numbers = #tpu.dot_dimension_numbers<[1], [0], [0], [1], [0, 0, 1, 1], [], []>} : vector<2x128xf32>, vector<128x8xf32>, vector<2x8xf32> -> vector<2x8xf32>
    %c0_27 = arith.constant 0 : index
    %c0_28 = arith.constant 0 : index
    %32 = vector.load %arg11[%c0_27, %c0_28] : memref<1x8xf32, #tpu.memory_space<vmem>>, vector<1x8xf32>
    %33 = vector.broadcast %32 : vector<1x8xf32> to vector<2x8xf32>
    %34 = arith.addf %31, %33 : vector<2x8xf32>
    %c0_29 = arith.constant 0 : index
    %c0_30 = arith.constant 0 : index
    %35 = vector.load %arg12[%c0_29, %c0_30] : memref<2x8xf32, #tpu.memory_space<vmem>>, vector<2x8xf32>
    tpu.vector_store %arg12[%c0_29, %c0_30], %34 {strides = array<i32>} : memref<2x8xf32, #tpu.memory_space<vmem>>, vector<2x8xf32>,
    return
  }
  func.func @transform_0(%arg0: i32) -> (i32, i32) {
    %c0_i32 = arith.constant 0 : i32
    %c0_i32_0 = arith.constant 0 : i32
    return %arg0, %c0_i32 : i32, i32
  }
  func.func @transform_1(%arg0: i32) -> (i32, i32) {
    %c0_i32 = arith.constant 0 : i32
    %c0_i32_0 = arith.constant 0 : i32
    %c0_i32_1 = arith.constant 0 : i32
    return %c0_i32, %c0_i32_0 : i32, i32
  }
  func.func @transform_2(%arg0: i32) -> (i32, i32) {
    %c0_i32 = arith.constant 0 : i32
    %c0_i32_0 = arith.constant 0 : i32
    %c0_i32_1 = arith.constant 0 : i32
    return %c0_i32, %c0_i32_0 : i32, i32
  }
  func.func @transform_3(%arg0: i32) -> (i32, i32) {
    %c0_i32 = arith.constant 0 : i32
    %c0_i32_0 = arith.constant 0 : i32
    %c0_i32_1 = arith.constant 0 : i32
    return %c0_i32, %c0_i32_0 : i32, i32
  }
  func.func @transform_4(%arg0: i32) -> (i32, i32) {
    %c0_i32 = arith.constant 0 : i32
    %c0_i32_0 = arith.constant 0 : i32
    %c0_i32_1 = arith.constant 0 : i32
    return %c0_i32, %c0_i32_0 : i32, i32
  }
  func.func @transform_5(%arg0: i32) -> (i32, i32) {
    %c0_i32 = arith.constant 0 : i32
    %c0_i32_0 = arith.constant 0 : i32
    %c0_i32_1 = arith.constant 0 : i32
    return %c0_i32, %c0_i32_0 : i32, i32
  }
  func.func @transform_6(%arg0: i32) -> (i32, i32) {
    %c0_i32 = arith.constant 0 : i32
    %c0_i32_0 = arith.constant 0 : i32
    %c0_i32_1 = arith.constant 0 : i32
    return %c0_i32, %c0_i32_0 : i32, i32
  }
  func.func @transform_7(%arg0: i32) -> (i32, i32) {
    %c0_i32 = arith.constant 0 : i32
    %c0_i32_0 = arith.constant 0 : i32
    %c0_i32_1 = arith.constant 0 : i32
    return %c0_i32, %c0_i32_0 : i32, i32
  }
  func.func @transform_8(%arg0: i32) -> (i32, i32) {
    %c0_i32 = arith.constant 0 : i32
    %c0_i32_0 = arith.constant 0 : i32
    %c0_i32_1 = arith.constant 0 : i32
    return %c0_i32, %c0_i32_0 : i32, i32
  }
  func.func @transform_9(%arg0: i32) -> (i32, i32) {
    %c0_i32 = arith.constant 0 : i32
    %c0_i32_0 = arith.constant 0 : i32
    %c0_i32_1 = arith.constant 0 : i32
    return %c0_i32, %c0_i32_0 : i32, i32
  }
  func.func @transform_10(%arg0: i32) -> (i32, i32) {
    %c0_i32 = arith.constant 0 : i32
    %c0_i32_0 = arith.constant 0 : i32
    %c0_i32_1 = arith.constant 0 : i32
    return %c0_i32, %c0_i32_0 : i32, i32
  }
  func.func @transform_11(%arg0: i32) -> (i32, i32) {
    %c0_i32 = arith.constant 0 : i32
    %c0_i32_0 = arith.constant 0 : i32
    return %arg0, %c0_i32 : i32, i32
  }
}

</mosaic_0001>

<bundles_post_ra>
// kernel: tpu_custom_call.1
= control target key start
LH: loop header
LB: loop body
LE: loop exit
PB: predicated region body
PF: predicated region fallthrough
CT: control target
= control target key end

     0   :  { %vm58_vm0 = vcmask 523264   ;;  %s1234_s0 = inlined_call_operand.vmem [shape: f32[32,64], index: 0, kind: input, shape index: {}]   ;;  %s1235_s1 = inlined_call_operand.vmem [shape: f32[64,128], index: 1, kind: input, shape index: {}]   ;;  %s1236_s2 = inlined_call_operand.vmem [shape: f32[1,128], index: 2, kind: input, shape index: {}]   ;;  %s1237_s3 = inlined_call_operand.vmem [shape: f32[128,64], index: 3, kind: input, shape index: {}]   ;;  %s1238_s4 = inlined_call_operand.vmem [shape: f32[1,64], index: 4, kind: input, shape index: {}]   ;;  %s1239_s5 = inlined_call_operand.vmem [shape: f32[64,32], index: 5, kind: input, shape index: {}]   ;;  %s1240_s6 = inlined_call_operand.vmem [shape: f32[1,32], index: 6, kind: input, shape index: {}]   ;;  %s1241_s7 = inlined_call_operand.vmem [shape: f32[32,128], index: 7, kind: input, shape index: {}]   ;;  %s1242_s8 = inlined_call_operand.vmem [shape: f32[16,128], index: 8, kind: input, shape index: {}]   ;;  %s1243_s9 = inlined_call_operand.vmem [shape: f32[128,8], index: 9, kind: input, shape index: {}]   ;;  %s1244_s10 = inlined_call_operand.vmem [shape: f32[1,8], index: 10, kind: input, shape index: {}]   ;;  %s1245_s11 = inlined_call_operand.hbm [shape: f32[2,8], index: 11, kind: output, shape index: {}]  }
   0x1   :  { %v43_v0 = vld [vmem:[%s1235_s1] sm:$0xff]  ;;  %v44_v1 = vld [vmem:[%s1235_s1 + $0x8] sm:$0xff]  ;;  %v45_v2 = vld [vmem:[%s1235_s1 + $0x10] sm:$0xff] }
   0x2   :  { %v840_v3 = vpack.c.bf16 %v44_v1, %v43_v0  ;;  %v46_v4 = vld [vmem:[%s1235_s1 + $0x18] sm:$0xff]  ;;  %v47_v6 = vld [vmem:[%s1235_s1 + $0x20] sm:$0xff]  ;;  %v48_v7 = vld [vmem:[%s1235_s1 + $0x28] sm:$0xff] }
   0x3   :  { %v844_v5 = vpack.c.bf16 %v46_v4, %v45_v2  ;;  %v39_v8 = vld [vmem:[%s1234_s0] sm:$0xff]  ;;  %v161_v10 = vld [vmem:[%s1237_s3 + $0x8] sm:$0xff]  ;;  %v162_v11 = vld [vmem:[%s1237_s3 + $0x10] sm:$0xff]  ;;  %v848_v12 = vpack.c.bf16 %v48_v7, %v47_v6 }
   0x4   :  { %841 = vmatprep.subr.bf16.mxu0 %v840_v3  ;;  %725 = vmatprep.mubr.msk.f32.mxu0 %vm58_vm0, %v39_v8  ;;  %v160_v9 = vld [vmem:[%s1237_s3] sm:$0xff]  ;;  %v49_v13 = vld [vmem:[%s1235_s1 + $0x30] sm:$0xff]  ;;  %v163_v15 = vld [vmem:[%s1237_s3 + $0x18] sm:$0xff] }
   0x5   :  { %843 = vmatpush3.bf16.msra.mxu0 %v840_v3  ;;  %v856_v14 = vpack.c.bf16 %v161_v10, %v160_v9  ;;  %v50_v16 = vld [vmem:[%s1235_s1 + $0x38] sm:$0xff]  ;;  %v860_v17 = vpack.c.bf16 %v163_v15, %v162_v11  ;;  %v164_v18 = vld [vmem:[%s1237_s3 + $0x20] sm:$0xff]  ;;  %v165_v19 = vld [vmem:[%s1237_s3 + $0x28] sm:$0xff] }
   0x6   :  { %845 = vmatprep.subr.bf16.mxu0 %v844_v5 }
   0x7   :  { %857 = vmatprep.subr.bf16.mxu1 %v856_v14 }
   0x8   :  { %859 = vmatpush3.bf16.msra.mxu1 %v856_v14 }
   0x9   :  { %847 = vmatpush3.bf16.msra.mxu0 %v844_v5 }
   0xa   :  { %16 = vsyncpa [#allocation3], 0  ;;  %849 = vmatprep.subr.bf16.mxu0 %v848_v12  ;;  %v852_v20 = vpack.c.bf16 %v50_v16, %v49_v13  ;;  %861 = vmatprep.subr.bf16.mxu1 %v860_v17  ;;  %v864_v21 = vpack.c.bf16 %v165_v19, %v164_v18  ;;  %v166_v22 = vld [vmem:[%s1237_s3 + $0x30] sm:$0xff]  ;;  %v167_v23 = vld [vmem:[%s1237_s3 + $0x38] sm:$0xff]  ;;  %vm392_vm1 = vcmask 261120   ;;  %vm965_vm2 = vmmov 0  }
   0xb   :  { %v868_v24 = vpack.c.bf16 %v167_v23, %v166_v22  ;;  %v168_v25 = vld [vmem:[%s1237_s3 + $0x40] sm:$0xff]  ;;  %v169_v26 = vld [vmem:[%s1237_s3 + $0x48] sm:$0xff]  ;;  %v41_v28 = vld [vmem:[%s1234_s0 + $0x10] sm:$0xff]  ;;  %v964_v23 = vmov 0.0|0.0   ;;  %vm535_vm3 = vcmask 1041409   ;;  %s967_s25 = smov [#allocation2]  }
   0xc   :  { %863 = vmatpush3.bf16.msra.mxu1 %v860_v17  ;;  %v40_v27 = vld [vmem:[%s1234_s0 + $0x8] sm:$0xff]  ;;  %v872_v29 = vpack.c.bf16 %v169_v26, %v168_v25  ;;  %v170_v30 = vld [vmem:[%s1237_s3 + $0x50] sm:$0xff]  ;;  %v171_v31 = vld [vmem:[%s1237_s3 + $0x58] sm:$0xff]  ;;  %vm608_vm4 = vcmask 58368  }
   0xd   :  { %851 = vmatpush3.bf16.msra.mxu0 %v848_v12  ;;  %865 = vmatprep.subr.bf16.mxu1 %v864_v21  ;;  %v42_v32 = vld [vmem:[%s1234_s0 + $0x18] sm:$0xff]  ;;  %v876_v33 = vpack.c.bf16 %v171_v31, %v170_v30  ;;  %v172_v34 = vld [vmem:[%s1237_s3 + $0x60] sm:$0xff]  ;;  %v173_v35 = vld [vmem:[%s1237_s3 + $0x68] sm:$0xff] }
   0xe   :  { %853 = vmatprep.subr.bf16.mxu0 %v852_v20  ;;  %v880_v36 = vpack.c.bf16 %v173_v35, %v172_v34  ;;  %v174_v37 = vld [vmem:[%s1237_s3 + $0x70] sm:$0xff]  ;;  %v175_v38 = vld [vmem:[%s1237_s3 + $0x78] sm:$0xff]  ;;  %v272_v40 = vld [vmem:[%s1239_s5] sm:$0xff] }
   0xf   :  { %v884_v39 = vpack.c.bf16 %v175_v38, %v174_v37  ;;  %v273_v41 = vld [vmem:[%s1239_s5 + $0x8] sm:$0xff]  ;;  %v274_v42 = vld [vmem:[%s1239_s5 + $0x10] sm:$0xff]  ;;  %v275_v44 = vld [vmem:[%s1239_s5 + $0x18] sm:$0xff] }
  0x10   :  { %867 = vmatpush3.bf16.msra.mxu1 %v864_v21  ;;  %v888_v43 = vpack.c.bf16 %v273_v41, %v272_v40  ;;  %v892_v45 = vpack.c.bf16 %v275_v44, %v274_v42  ;;  %v276_v46 = vld [vmem:[%s1239_s5 + $0x20] sm:$0xff]  ;;  %v277_v47 = vld [vmem:[%s1239_s5 + $0x28] sm:$0xff]  ;;  %v278_v62 = vld [vmem:[%s1239_s5 + $0x30] sm:$0xff] }
  0x11   :  { %855 = vmatpush3.bf16.msra.mxu0 %v852_v20  ;;  %869 = vmatprep.subr.bf16.mxu1 %v868_v24  ;;  %v896_v48 = vpack.c.bf16 %v277_v47, %v276_v46  ;;  %v624_v49 = vld [vmem:[%s1236_s2] ss:$0 sm:$0xff]  ;;  %v279_v63 = vld [vmem:[%s1239_s5 + $0x38] sm:$0xff]  ;;  %v389_v2 = vld [vmem:[%s1241_s7 + $0x8] sm:$0xff] }
  0x12   :  { %889 = vmatprep.subr.bf16.mxu0 %v888_v43  ;;  %v900_v0 = vpack.c.bf16 %v279_v63, %v278_v62  ;;  %v388_v1 = vld [vmem:[%s1241_s7] sm:$0xff]  ;;  %v390_v17 = vld [vmem:[%s1241_s7 + $0x10] sm:$0xff]  ;;  %v391_v18 = vld [vmem:[%s1241_s7 + $0x18] sm:$0xff] }
  0x13   :  { %v904_v3 = vpack.c.bf16 %v389_v2, %v388_v1  ;;  %v629_v4 = vld [vmem:[%s1238_s4] ss:$0 sm:$0xff]  ;;  %v908_v19 = vpack.c.bf16 %v391_v18, %v390_v17  ;;  %v511_v21 = vld [vmem:[%s1243_s9 + $0x8] sm:$0xff]  ;;  %v512_v22 = vld [vmem:[%s1243_s9 + $0x10] sm:$0xff] }
  0x14   :  { %726 = vmatmul.mubr.msk.f32.vlgmr.msra.gmra.mrb[0].mxu0 %vm58_vm0, %v40_v27  ;;  %871 = vmatpush3.bf16.msra.mxu1 %v868_v24  ;;  %v510_v20 = vld [vmem:[%s1243_s9] sm:$0xff]  ;;  %v513_v25 = vld [vmem:[%s1243_s9 + $0x18] sm:$0xff]  ;;  %v515_v41 = vld [vmem:[%s1243_s9 + $0x28] sm:$0xff] }
  0x15   :  { %728 = vmatprep.mubr.msk.f32.mxu0 %vm58_vm0, %v41_v28  ;;  %873 = vmatprep.subr.bf16.mxu1 %v872_v29  ;;  %v913_v24 = vpack.c.bf16 %v511_v21, %v510_v20  ;;  %v916_v26 = vpack.c.bf16 %v513_v25, %v512_v22  ;;  %v630_v27 = vld [vmem:[%s1240_s6] ss:$0 sm:$0xff]  ;;  %v517_v44 = vld [vmem:[%s1243_s9 + $0x38] sm:$0xff]  ;;  %v519_v47 = vld [vmem:[%s1243_s9 + $0x48] sm:$0xff]  ;;  %s616_s6 = sshll.u32 %s967_s25, 4  ;;  %s617_s6 = int_to_ptr.vmem [resolvable:$true] %s616_s6 }
  0x16   :  { %891 = vmatpush3.bf16.msra.mxu0 %v888_v43  ;;  %v514_v40 = vld [vmem:[%s1243_s9 + $0x20] sm:$0xff]  ;;  %v516_v43 = vld [vmem:[%s1243_s9 + $0x30] sm:$0xff]  ;;  %s940_s26 = scalar_lea.vmem %s617_s6, 32  ;;  %p945_p1 = scmp.lt.s32.totalorder %s617_s6, %s617_s6 }
  0x17   :  { %893 = vmatprep.subr.bf16.mxu0 %v892_v45  ;;  %v919_v42 = vpack.c.bf16 %v515_v41, %v514_v40  ;;  %v518_v46 = vld [vmem:[%s1243_s9 + $0x40] sm:$0xff]  ;;  %p941_p0 = scmp.ne.s32.totalorder %s617_s6, %s940_s26  ;;  %p946_p2 = scmp.lt.s32.totalorder %s940_s26, %s940_s26 }
  0x18   :  { %729 = vmatmul.mubr.msk.f32.gmra.mrb[2].mxu0 %vm58_vm0, %v42_v32  ;;  %875 = vmatpush3.bf16.msra.mxu1 %v872_v29  ;;  %v639_v20 = vld [vmem:[%s1244_s10] ss:$0 sm:$0xff] }
  0x19   :  { %877 = vmatprep.subr.bf16.mxu1 %v876_v33  ;;  %p947_p3 = por %p946_p2, %p945_p1 }
  0x1a   :  { %895 = vmatpush3.bf16.msra.mxu0 %v892_v45  ;;  %v922_v45 = vpack.c.bf16 %v517_v44, %v516_v43 }
  0x1b   :  { %897 = vmatprep.subr.bf16.mxu0 %v896_v48  ;;  %p948_p4 = pnand %p947_p3, %p941_p0 }
  0x1c   :  { %879 = vmatpush3.bf16.msra.mxu1 %v876_v33 }
  0x1d   :  { %881 = vmatprep.subr.bf16.mxu1 %v880_v36 }
  0x1e   :  { %899 = vmatpush3.bf16.msra.mxu0 %v896_v48  ;;  %v925_v48 = vpack.c.bf16 %v519_v47, %v518_v46 }
  0x1f   :  { %901 = vmatprep.subr.bf16.mxu0 %v900_v0 }
  0x20   :  { %883 = vmatpush3.bf16.msra.mxu1 %v880_v36 }
  0x21   :  { %885 = vmatprep.subr.bf16.mxu1 %v884_v39 }
  0x22   :  { %903 = vmatpush3.bf16.msra.mxu0 %v900_v0 }
  0x23   :  { %905 = vmatprep.subr.bf16.mxu0 %v904_v3 }
  0x24   :  { %887 = vmatpush3.bf16.msra.mxu1 %v884_v39 }
  0x25   :  { %912 = vmatprep.subr.bf16.mxu1 %v964_v23 }
  0xe7   :  { %v727_v50 = vpop.f32.mrb[0].mxu0 }
  0xe8   :  { %v143_v51 = vadd.f32 %v727_v50, %v624_v49  ;;  %v137_v52 = vpop.f32.mrb[1].mxu0  ;;  %v521_v50 = vld [vmem:[%s1243_s9 + $0x58] sm:$0xff] }
  0xe9   :  { %v138_v53 = vadd.f32 %v624_v49, %v137_v52  ;;  %v522_v52 = vld [vmem:[%s1243_s9 + $0x60] sm:$0xff] }
  0xea   :  { %v157_v56 = vmax.f32 %v143_v51, 0.0 }
  0xeb   :  { %v730_v54 = vpop.f32.mrb[2].mxu0  ;;  %v156_v55 = vmax.f32 %v138_v53, 0.0  ;;  %v523_v53 = vld [vmem:[%s1243_s9 + $0x68] sm:$0xff] }
  0xec   :  { %v153_v57 = vadd.f32 %v730_v54, %v624_v49  ;;  %v147_v58 = vpop.f32.mrb[3].mxu0  ;;  %v931_v54 = vpack.c.bf16 %v523_v53, %v522_v52 }
  0xed   :  { %v148_v59 = vadd.f32 %v624_v49, %v147_v58  ;;  %763 = vmatprep.mubr.f32.mxu1 %v156_v55  ;;  %v520_v49 = vld [vmem:[%s1243_s9 + $0x50] sm:$0xff]  ;;  %v966_v58 = vmov 0.0  }
  0xee   :  { %764 = vmatmul.mubr.f32.vlgmr.msra.gmra.mrb[0].mxu1 %v157_v56  ;;  %v159_v61 = vmax.f32 %v153_v57, 0.0  ;;  %v928_v51 = vpack.c.bf16 %v521_v50, %v520_v49  ;;  %v524_v55 = vld [vmem:[%s1243_s9 + $0x70] sm:$0xff]  ;;  %v525_v56 = vld [vmem:[%s1243_s9 + $0x78] sm:$0xff] }
  0xef   :  { %v158_v60 = vmax.f32 %v148_v59, 0.0  ;;  %914 = vmatpush3.bf16.msra.mxu1 %v913_v24  ;;  %v934_v57 = vpack.c.bf16 %v525_v56, %v524_v55  ;;  %v491_v59 = vld [vmem:[%s1242_s8 + $0x8] sm:$0xff] }
  0xf0   :  { %915 = vmatprep.subr.bf16.mxu1 %v964_v23 }
  0xf1   :  { %766 = vmatprep.mubr.f32.mxu1 %v158_v60  ;;  %v490_v60 = vld [vmem:[%s1242_s8] sm:$0xff] }
  0xf2   :  { %767 = vmatmul.mubr.f32.gmra.mrb[2].mxu1 %v159_v61 }
  0xf3   :  { %917 = vmatpush3.bf16.msra.mxu1 %v916_v26  ;;  %837 = vmatprep.mubr.msk.f32.mxu1 %vm965_vm2, %v966_v58 }
  0xf4   :  { %918 = vmatprep.subr.bf16.mxu1 %v964_v23 }
  0xf7   :  { %920 = vmatpush3.bf16.msra.mxu1 %v919_v42 }
  0xf8   :  { %921 = vmatprep.subr.bf16.mxu1 %v964_v23 }
  0xfb   :  { %923 = vmatpush3.bf16.msra.mxu1 %v922_v45 }
  0xfc   :  { %924 = vmatprep.subr.bf16.mxu1 %v964_v23 }
  0xff   :  { %926 = vmatpush3.bf16.msra.mxu1 %v925_v48 }
 0x100   :  { %927 = vmatprep.subr.bf16.mxu1 %v964_v23 }
 0x103   :  { %929 = vmatpush3.bf16.msra.mxu1 %v928_v51 }
 0x104   :  { %930 = vmatprep.subr.bf16.mxu1 %v964_v23 }
 0x107   :  { %932 = vmatpush3.bf16.msra.mxu1 %v931_v54 }
 0x108   :  { %933 = vmatprep.subr.bf16.mxu1 %v964_v23 }
 0x10b   :  { %935 = vmatpush3.bf16.msra.mxu1 %v934_v57 }
 0x1c1   :  { %v765_v5 = vpop.f32.mrb[0].mxu1 }
 0x1c2   :  { %v255_v6 = vadd.f32 %v765_v5, %v629_v4  ;;  %v249_v7 = vpop.f32.mrb[1].mxu1 }
 0x1c3   :  { %v250_v8 = vadd.f32 %v629_v4, %v249_v7 }
 0x1c4   :  { %v269_v11 = vmax.f32 %v255_v6, 0.0 }
 0x1c5   :  { %v268_v9 = vmax.f32 %v250_v8, 0.0  ;;  %v768_v10 = vpop.f32.mrb[2].mxu1 }
 0x1c6   :  { %v265_v12 = vadd.f32 %v768_v10, %v629_v4  ;;  %v259_v13 = vpop.f32.mrb[3].mxu1 }
 0x1c7   :  { %v260_v14 = vadd.f32 %v629_v4, %v259_v13  ;;  %785 = vmatprep.mubr.msk.f32.mxu0 %vm58_vm0, %v268_v9 }
 0x1c8   :  { %786 = vmatmul.mubr.msk.f32.vlgmr.msra.gmra.mrb[4].mxu0 %vm58_vm0, %v269_v11  ;;  %v271_v16 = vmax.f32 %v265_v12, 0.0 }
 0x1c9   :  { %v270_v15 = vmax.f32 %v260_v14, 0.0  ;;  %907 = vmatpush3.bf16.msra.mxu0 %v904_v3 }
 0x1ca   :  { %909 = vmatprep.subr.bf16.mxu0 %v908_v19 }
 0x1cb   :  { %788 = vmatprep.mubr.msk.f32.mxu0 %vm58_vm0, %v270_v15 }
 0x1cc   :  { %789 = vmatmul.mubr.msk.f32.gmra.mrb[6].mxu0 %vm58_vm0, %v271_v16 }
 0x1cd   :  { %911 = vmatpush3.bf16.msra.mxu0 %v908_v19 }
 0x29b   :  { %v787_v28 = vpop.f32.mrb[4].mxu0 }
 0x29c   :  { %v371_v29 = vadd.f32 %v787_v28, %v630_v27  ;;  %v365_v30 = vpop.f32.mrb[5].mxu0 }
 0x29d   :  { %v366_v31 = vadd.f32 %v630_v27, %v365_v30 }
 0x29e   :  { %v385_v34 = vmax.f32 %v371_v29, 0.0 }
 0x29f   :  { %v384_v32 = vmax.f32 %v366_v31, 0.0  ;;  %v790_v33 = vpop.f32.mrb[6].mxu0 }
 0x2a0   :  { %v381_v35 = vadd.f32 %v790_v33, %v630_v27  ;;  %v375_v36 = vpop.f32.mrb[7].mxu0 }
 0x2a1   :  { %v376_v37 = vadd.f32 %v630_v27, %v375_v36  ;;  %799 = vmatprep.mubr.msk.f32.mxu0 %vm392_vm1, %v384_v32 }
 0x2a2   :  { %800 = vmatmul.mubr.msk.f32.vlgmr.msra.gmra.mrb[8].mxu0 %vm392_vm1, %v385_v34  ;;  %v387_v39 = vmax.f32 %v381_v35, 0.0 }
 0x2a3   :  { %v386_v38 = vmax.f32 %v376_v37, 0.0 }
 0x2a5   :  { %802 = vmatprep.mubr.msk.f32.mxu0 %vm392_vm1, %v386_v38 }
 0x2a6   :  { %803 = vmatmul.mubr.msk.f32.gmra.mrb[10].mxu0 %vm392_vm1, %v387_v39 }
 0x375   :  { %v801_v61 = vpop.f32.mrb[8].mxu0 }
 0x376   :  { %v493_v62 = vmul.f32 %v801_v61, %v491_v59  ;;  %v471_v63 = vpop.f32.mrb[9].mxu0 }
 0x377   :  { %v492_v0 = vmul.f32 %v490_v60, %v471_v63 }
 0x379   :  { %v496_v1 = vadd.f32 %v493_v62, %v492_v0  ;;  %v804_v2 = vpop.f32.mrb[10].mxu0 }
 0x37a   :  { %v495_v3 = vmul.f32 %v804_v2, %v491_v59  ;;  %v481_v4 = vpop.f32.mrb[11].mxu0 }
 0x37b   :  { %v497_v5 = vrot.slane %v496_v1, 4  ;;  %v494_v6 = vmul.f32 %v490_v60, %v481_v4 }
 0x37d   :  { %v498_v7 = vadd.f32 %v497_v5, %v496_v1  ;;  %v503_v8 = vadd.f32 %v495_v3, %v494_v6 }
 0x37f   :  { %v499_v9 = vrot.slane %v498_v7, 2  ;;  %v504_v10 = vrot.slane %v503_v8, 4 }
 0x381   :  { %v500_v11 = vadd.f32 %v499_v9, %v498_v7  ;;  %v505_v12 = vadd.f32 %v504_v10, %v503_v8 }
 0x383   :  { %v506_v13 = vrot.slane %v505_v12, 2  ;;  %v501_v14 = vrot.slane %v500_v11, 1 }
 0x385   :  { %v507_v15 = vadd.f32 %v506_v13, %v505_v12  ;;  %v502_v17 = vadd.f32 %v501_v14, %v500_v11 }
 0x387   :  { %v508_v16 = vrot.slane %v507_v15, 1 }
 0x389   :  { %v509_v18 = vadd.f32 %v508_v16, %v507_v15 }
 0x38b   :  { %v536_v19 = vsel %vm535_vm3, %v509_v18, %v502_v17 }
 0x38c   :  { %838 = vmatmul.mubr.f32.vlgmr.msra.gmra.mrb[4].mxu1 %v536_v19 }
 0x45f   :  { %v604_v21 = vpop.f32.mrb[4].mxu1 }
 0x460   :  { %v605_v22 = vadd.f32 %v639_v20, %v604_v21  ;;  %v839_v23 = vpop.f32.mrb[5].mxu1 }
 0x462   :  { %609 = vst.msk [vmem:[#allocation2] sm:$0x3] %vm608_vm4, %v605_v22 }
 0x463   :  { %951 = shalt.err (!%p948_p4)
}
 0x464   :  { %s952_s28 = scalar_lea.hbm %s1245_s11, 32 }
 0x465   :  { %p953_p5 = scmp.ne.s32.totalorder %s1245_s11, %s952_s28  ;;  %p956_p6 = scmp.lt.u32.totalorder %s952_s28, %s1245_s11 }
 0x467   :  { %p958_p7 = pnand %p956_p6, %p953_p5 }
 0x469   :  { %961 = shalt.err (!%p958_p7)
}
 0x46a   :  { %619 = dma.vmem_to_hbm [thread:$0]  %s617_s6, 32, %s1245_s11, [#allocation3]  }
 0x46b   :  { %962 = dma.done.wait [#allocation3], 32  }
 0x46c   :  { %963 = vsyncadd [#allocation3], 4294967264 }
 0x46d   :  { %623 = vsyncpa [#allocation3], 1 }

</bundles_post_ra>
